<compile_context>
chip_gen: v6e
topology: v6e:2x2x1
jax: 0.10.0
libtpu: 0.0.40
codegen_flags: <defaults>
</compile_context>

<pallas_src>
import functools
import math

import jax
import jax.numpy as jnp
from jax import lax
from jax.experimental import pallas as pl
from jax.experimental.pallas import tpu as pltpu

BBOX_SIZE = 5          # BoundingBox2DIndex.size()
POINT_END = 2          # BoundingBox2DIndex.POINT == slice(0, 2)
HEADING_IDX = 2        # BoundingBox2DIndex.HEADING
OUT_ROWS = 6           # output rows: states(5) + label(1); lanes = agent rows


def _round_up(x: int, m: int) -> int:
    return ((x + m - 1) // m) * m


def _cdiv(a: int, b: int) -> int:
    return -(-a // b)


def _agent_head_kernel(q_ref, w1ct_ref, b1ct_ref, w2e_ref, b2e_ref, out_ref, *, d_ffn):
    """One row-block of the AgentHead forward, computed transposed (lane-dense).

    q_ref    : (TM, D)        compute_dtype (f32 or bf16)
    w1ct_ref : (F+1, D)       compute_dtype   -- [w1 | wl]^T fused
    b1ct_ref : (F+1, 1)       f32             -- [b1 | bl]^T fused
    w2e_ref  : (6, F+1)       compute_dtype   -- rows 0..4 = [w2^T | 0], row 5 = e_F
    b2e_ref  : (6, 1)         f32             -- rows 0..4 = b2, row 5 = 0
    out_ref  : (6, TM)        f32             -- rows: x,y,heading,length,width,label
    """
    q = q_ref[...]                                               # (TM, D)

    # z^T = [w1 | wl]^T @ q^T  (A.B^T form: contract D with D), f32 accumulation.
    zt = lax.dot_general(
        w1ct_ref[...], q,
        dimension_numbers=(((1,), (1,)), ((), ())),
        preferred_element_type=jnp.float32) + b1ct_ref[...]      # (F+1, TM)

    # ReLU only on the hidden rows; the label row (index F) passes through so the
    # one-hot row of W2e can copy the raw label logit into output row 5.
    row_z = lax.broadcasted_iota(jnp.int32, zt.shape, 0)
    ht = jnp.where(row_z < d_ffn, jnp.maximum(zt, 0.0), zt)      # (F+1, TM)

    # s^T = W2e @ h^T : rows 0..4 = Linear(F, 5), row 5 = label passthrough.
    st = jnp.dot(w2e_ref[...], ht.astype(w2e_ref.dtype),
                 preferred_element_type=jnp.float32) + b2e_ref[...]   # (6, TM)

    # tanh * [32, 32, pi] on rows 0..2 only; rows 3..5 unchanged. Branch-free,
    # scalar literals only (no captured constant arrays). Single dense store.
    row_s = lax.broadcasted_iota(jnp.int32, st.shape, 0)
    scale = jnp.where(row_s == HEADING_IDX, math.pi, 32.0)
    out_ref[...] = jnp.where(row_s < POINT_END + 1, jnp.tanh(st) * scale, st)


def agent_head_forward(agent_queries, params, *,
                       compute_dtype=jnp.bfloat16, block_rows=2048):
    """agent_queries: (B, N, d_model) float32.
    params: dict with w1 (D,F), b1 (1,F), w2 (F,5), b2 (1,5), wl (D,1), bl (1,1).
    compute_dtype: MXU operand dtype (bf16 default on all TPU generations; use
      jnp.float32 for bit-faithful module semantics). Accumulation is f32 either way.
    Returns {'agent_states': (B, N, 5), 'agent_labels': (B, N)} in float32."""
    B, N, D = agent_queries.shape
    F = params["w1"].shape[1]
    M = B * N

    # Row tiling: tm multiple of 128 (lane dim of the transposed output block),
    # grid an even number of blocks so both v7x TensorCores are fed; padded rows
    # are zero and sliced off below.
    n_blocks = max(2, _cdiv(M, block_rows))
    if n_blocks % 2:
        n_blocks += 1
    tm = _round_up(_cdiv(M, n_blocks), 128)
    m_pad = n_blocks * tm

    q2d = agent_queries.reshape(M, D).astype(compute_dtype)
    if m_pad != M:
        q2d = jnp.pad(q2d, ((0, m_pad - M), (0, 0)))

    # Fused / extended weights (tiny; built once at trace time).
    w1ct = jnp.concatenate([params["w1"], params["wl"]], axis=1).T.astype(compute_dtype)  # (F+1, D)
    b1ct = jnp.concatenate([params["b1"], params["bl"]], axis=1).T.astype(jnp.float32)    # (F+1, 1)
    w2e = jnp.zeros((OUT_ROWS, F + 1), jnp.float32)
    w2e = w2e.at[:BBOX_SIZE, :F].set(params["w2"].T)        # Linear(F, 5)
    w2e = w2e.at[BBOX_SIZE, F].set(1.0)                     # label passthrough
    w2e = w2e.astype(compute_dtype)
    b2e = jnp.zeros((OUT_ROWS, 1), jnp.float32)
    b2e = b2e.at[:BBOX_SIZE, 0].set(params["b2"][0])

    itemsize = jnp.dtype(compute_dtype).itemsize
    cost = pl.CostEstimate(
        flops=2 * m_pad * D * (F + 1) + 2 * m_pad * (F + 1) * OUT_ROWS,
        transcendentals=3 * m_pad,
        bytes_accessed=(m_pad * D * itemsize + OUT_ROWS * m_pad * 4
                        + (F + 1) * (D + OUT_ROWS) * itemsize + (F + 1 + OUT_ROWS) * 4),
    )

    kernel = functools.partial(_agent_head_kernel, d_ffn=F)

    out_t = pl.pallas_call(
        kernel,
        out_shape=jax.ShapeDtypeStruct((OUT_ROWS, m_pad), jnp.float32),
        grid_spec=pltpu.PrefetchScalarGridSpec(
            num_scalar_prefetch=0,
            grid=(n_blocks,),
            in_specs=[
                pl.BlockSpec((tm, D), lambda i: (i, 0)),            # q row block
                pl.BlockSpec((F + 1, D), lambda i: (0, 0)),         # [w1 | wl]^T
                pl.BlockSpec((F + 1, 1), lambda i: (0, 0)),         # [b1 | bl]^T
                pl.BlockSpec((OUT_ROWS, F + 1), lambda i: (0, 0)),  # W2e
                pl.BlockSpec((OUT_ROWS, 1), lambda i: (0, 0)),      # b2e
            ],
            out_specs=pl.BlockSpec((OUT_ROWS, tm), lambda i: (0, i)),
        ),
        compiler_params=pltpu.CompilerParams(
            dimension_semantics=("parallel",)),
        cost_estimate=cost,
    )(q2d, w1ct, b1ct, w2e, b2e)

    states = out_t[:BBOX_SIZE, :M].T.reshape(B, N, BBOX_SIZE)
    labels = out_t[BBOX_SIZE, :M].reshape(B, N)        # .squeeze(dim=-1)
    return {"agent_states": states, "agent_labels": labels}


def init_params(key, d_model, d_ffn):
    """Deterministic synthetic parameters (shapes match AgentHead.__init__)."""
    ks = jax.random.split(key, 6)
    scale = 0.02
    return {
        "w1": scale * jax.random.normal(ks[0], (d_model, d_ffn), jnp.float32),
        "b1": scale * jax.random.normal(ks[1], (1, d_ffn), jnp.float32),
        "w2": scale * jax.random.normal(ks[2], (d_ffn, BBOX_SIZE), jnp.float32),
        "b2": scale * jax.random.normal(ks[3], (1, BBOX_SIZE), jnp.float32),
        "wl": scale * jax.random.normal(ks[4], (d_model, 1), jnp.float32),
        "bl": scale * jax.random.normal(ks[5], (1, 1), jnp.float32),
    }


def _reference_forward(agent_queries, params, compute_dtype=jnp.float32):
    """Pure-JAX reference mirroring the PyTorch forward (and the kernel's operand
    casting, so the bf16 path can be validated apples-to-apples)."""
    cd = compute_dtype
    q = agent_queries.astype(cd)
    h = jnp.maximum(
        jnp.dot(q, params["w1"].astype(cd), preferred_element_type=jnp.float32)
        + params["b1"][0], 0.0)
    s = (jnp.dot(h.astype(cd), params["w2"].astype(cd),
                 preferred_element_type=jnp.float32) + params["b2"][0])
    point = jnp.tanh(s[..., :POINT_END]) * 32.0
    heading = jnp.tanh(s[..., HEADING_IDX:HEADING_IDX + 1]) * math.pi
    rest = s[..., HEADING_IDX + 1:]
    states = jnp.concatenate([point, heading, rest], axis=-1)
    labels = (jnp.dot(q, params["wl"].astype(cd),
                      preferred_element_type=jnp.float32) + params["bl"][0])[..., 0]
    return states, labels


if __name__ == "__main__":
    B, N, D_MODEL, D_FFN = 2, 8, 32, 64   # small shapes consistent with the module
    key = jax.random.PRNGKey(0)
    kq, kp = jax.random.split(key)

    agent_queries = jax.random.normal(kq, (B, N, D_MODEL), jnp.float32)
    params = init_params(kp, D_MODEL, D_FFN)

    # --- float32 path: exact module semantics ---------------------------------
    out = agent_head_forward(agent_queries, params, compute_dtype=jnp.float32)
    jax.block_until_ready(out)
    ref_states, ref_labels = _reference_forward(agent_queries, params, jnp.float32)
    assert out["agent_states"].shape == (B, N, BBOX_SIZE)
    assert out["agent_labels"].shape == (B, N)
    assert jnp.allclose(out["agent_states"], ref_states, atol=1e-4, rtol=1e-4)
    assert jnp.allclose(out["agent_labels"], ref_labels, atol=1e-4, rtol=1e-4)

    # --- bf16 MXU-operand path (default; all generations), f32 accumulation ---
    out_bf16 = agent_head_forward(agent_queries, params, compute_dtype=jnp.bfloat16)
    jax.block_until_ready(out_bf16)
    ref_states_b, ref_labels_b = _reference_forward(agent_queries, params,
                                                    jnp.bfloat16)
    assert jnp.allclose(out_bf16["agent_states"], ref_states_b, atol=1e-2, rtol=1e-2)
    assert jnp.allclose(out_bf16["agent_labels"], ref_labels_b, atol=1e-2, rtol=1e-2)

    print("KERNEL_OK")
</pallas_src>

<mosaic_0001>
module attributes {stable_mosaic.version = 11 : i64} {
  func.func @_agent_head_kernel(%arg0: i32, %arg1: memref<128x32xf32, #tpu.memory_space<vmem>>, %arg2: memref<65x32xf32, #tpu.memory_space<vmem>>, %arg3: memref<65x1xf32, #tpu.memory_space<vmem>>, %arg4: memref<6x65xf32, #tpu.memory_space<vmem>>, %arg5: memref<6x1xf32, #tpu.memory_space<vmem>>, %arg6: memref<6x128xf32, #tpu.memory_space<vmem>>) attributes {dimension_semantics = [#tpu.dimension_semantics<parallel>], iteration_bounds = array<i64: 2>, scalar_prefetch = 0 : i64, scratch_operands = 0 : i64, tpu.core_type = #tpu.core_type<tc>, window_params = [{transform_indices = @transform_0, window_bounds = array<i64: 128, 32>}, {pipeline_mode = #tpu.pipeline_mode<synchronous>, transform_indices = @transform_1, window_bounds = array<i64: 65, 32>}, {pipeline_mode = #tpu.pipeline_mode<synchronous>, transform_indices = @transform_2, window_bounds = array<i64: 65, 1>}, {pipeline_mode = #tpu.pipeline_mode<synchronous>, transform_indices = @transform_3, window_bounds = array<i64: 6, 65>}, {pipeline_mode = #tpu.pipeline_mode<synchronous>, transform_indices = @transform_4, window_bounds = array<i64: 6, 1>}, {transform_indices = @transform_5, window_bounds = array<i64: 6, 128>}]} {
    %c0 = arith.constant 0 : index
    %c0_0 = arith.constant 0 : index
    %0 = vector.load %arg1[%c0, %c0_0] : memref<128x32xf32, #tpu.memory_space<vmem>>, vector<128x32xf32>
    %c0_1 = arith.constant 0 : index
    %c0_2 = arith.constant 0 : index
    %1 = vector.load %arg2[%c0_1, %c0_2] : memref<65x32xf32, #tpu.memory_space<vmem>>, vector<65x32xf32>
    %cst = arith.constant dense<0.000000e+00> : vector<65x128xf32>
    %2 = tpu.matmul %1, %0, %cst {dimension_numbers = #tpu.dot_dimension_numbers<[1], [1], [0], [0], [0, 0, 1, 0], [], []>} : vector<65x32xf32>, vector<128x32xf32>, vector<65x128xf32> -> vector<65x128xf32>
    %c0_3 = arith.constant 0 : index
    %c0_4 = arith.constant 0 : index
    %3 = vector.load %arg3[%c0_3, %c0_4] : memref<65x1xf32, #tpu.memory_space<vmem>>, vector<65x1xf32>
    %4 = vector.broadcast %3 : vector<65x1xf32> to vector<65x128xf32>
    %5 = arith.addf %2, %4 : vector<65x128xf32>
    %6 = tpu.iota {dimensions = array<i32: 0>} : vector<65x128xi32>
    %c64_i32 = arith.constant 64 : i32
    %7 = vector.broadcast %c64_i32 : i32 to vector<65x128xi32>
    %8 = arith.cmpi slt, %6, %7 : vector<65x128xi32>
    %cst_5 = arith.constant 0.000000e+00 : f32
    %9 = vector.broadcast %cst_5 : f32 to vector<65x128xf32>
    %10 = arith.maximumf %5, %9 : vector<65x128xf32>
    %11 = arith.select %8, %10, %5 : vector<65x128xi1>, vector<65x128xf32>
    %c0_6 = arith.constant 0 : index
    %c0_7 = arith.constant 0 : index
    %12 = vector.load %arg4[%c0_6, %c0_7] : memref<6x65xf32, #tpu.memory_space<vmem>>, vector<6x65xf32>
    %cst_8 = arith.constant dense<0.000000e+00> : vector<6x128xf32>
    %13 = tpu.matmul %12, %11, %cst_8 {dimension_numbers = #tpu.dot_dimension_numbers<[1], [0], [0], [1], [0, 0, 1, 1], [], []>} : vector<6x65xf32>, vector<65x128xf32>, vector<6x128xf32> -> vector<6x128xf32>
    %c0_9 = arith.constant 0 : index
    %c0_10 = arith.constant 0 : index
    %14 = vector.load %arg5[%c0_9, %c0_10] : memref<6x1xf32, #tpu.memory_space<vmem>>, vector<6x1xf32>
    %15 = vector.broadcast %14 : vector<6x1xf32> to vector<6x128xf32>
    %16 = arith.addf %13, %15 : vector<6x128xf32>
    %17 = tpu.iota {dimensions = array<i32: 0>} : vector<6x128xi32>
    %c2_i32 = arith.constant 2 : i32
    %18 = vector.broadcast %c2_i32 : i32 to vector<6x128xi32>
    %19 = arith.cmpi eq, %17, %18 : vector<6x128xi32>
    %cst_11 = arith.constant 3.14159274 : f32
    %cst_12 = arith.constant 3.200000e+01 : f32
    %20 = vector.broadcast %cst_11 : f32 to vector<6x128xf32>
    %21 = vector.broadcast %cst_12 : f32 to vector<6x128xf32>
    %22 = arith.select %19, %20, %21 : vector<6x128xi1>, vector<6x128xf32>
    %c3_i32 = arith.constant 3 : i32
    %23 = vector.broadcast %c3_i32 : i32 to vector<6x128xi32>
    %24 = arith.cmpi slt, %17, %23 : vector<6x128xi32>
    %25 = math.tanh %16 : vector<6x128xf32>
    %26 = arith.mulf %25, %22 : vector<6x128xf32>
    %27 = arith.select %24, %26, %16 : vector<6x128xi1>, vector<6x128xf32>
    %c0_13 = arith.constant 0 : index
    %c0_14 = arith.constant 0 : index
    %28 = vector.load %arg6[%c0_13, %c0_14] : memref<6x128xf32, #tpu.memory_space<vmem>>, vector<6x128xf32>
    tpu.vector_store %arg6[%c0_13, %c0_14], %27 {strides = array<i32>} : memref<6x128xf32, #tpu.memory_space<vmem>>, vector<6x128xf32>,
    return
  }
  func.func @transform_0(%arg0: i32) -> (i32, i32) {
    %c0_i32 = arith.constant 0 : i32
    %c0_i32_0 = arith.constant 0 : i32
    return %arg0, %c0_i32 : i32, i32
  }
  func.func @transform_1(%arg0: i32) -> (i32, i32) {
    %c0_i32 = arith.constant 0 : i32
    %c0_i32_0 = arith.constant 0 : i32
    %c0_i32_1 = arith.constant 0 : i32
    return %c0_i32, %c0_i32_0 : i32, i32
  }
  func.func @transform_2(%arg0: i32) -> (i32, i32) {
    %c0_i32 = arith.constant 0 : i32
    %c0_i32_0 = arith.constant 0 : i32
    %c0_i32_1 = arith.constant 0 : i32
    return %c0_i32, %c0_i32_0 : i32, i32
  }
  func.func @transform_3(%arg0: i32) -> (i32, i32) {
    %c0_i32 = arith.constant 0 : i32
    %c0_i32_0 = arith.constant 0 : i32
    %c0_i32_1 = arith.constant 0 : i32
    return %c0_i32, %c0_i32_0 : i32, i32
  }
  func.func @transform_4(%arg0: i32) -> (i32, i32) {
    %c0_i32 = arith.constant 0 : i32
    %c0_i32_0 = arith.constant 0 : i32
    %c0_i32_1 = arith.constant 0 : i32
    return %c0_i32, %c0_i32_0 : i32, i32
  }
  func.func @transform_5(%arg0: i32) -> (i32, i32) {
    %c0_i32 = arith.constant 0 : i32
    %c0_i32_0 = arith.constant 0 : i32
    return %c0_i32, %arg0 : i32, i32
  }
}

</mosaic_0001>

<bundles_post_ra>
// kernel: tpu_custom_call.1
= control target key start
LH: loop header
LB: loop body
LE: loop exit
PB: predicated region body
PF: predicated region fallthrough
CT: control target
= control target key end

     0   :  { %10 = vsyncpa [#allocation3], 0  ;;  %s1229_s0 = inlined_call_operand.vmem [shape: f32[256,32], index: 0, kind: input, shape index: {}]   ;;  %s1230_s1 = inlined_call_operand.vmem [shape: f32[65,32], index: 1, kind: input, shape index: {}]   ;;  %s1231_s2 = inlined_call_operand.vmem [shape: f32[65,1], index: 2, kind: input, shape index: {}]   ;;  %s1232_s3 = inlined_call_operand.vmem [shape: f32[6,65], index: 3, kind: input, shape index: {}]   ;;  %s1233_s4 = inlined_call_operand.vmem [shape: f32[6,1], index: 4, kind: input, shape index: {}]   ;;  %s1234_s5 = inlined_call_operand.hbm [shape: f32[6,256], index: 5, kind: output, shape index: {}]  }
   0x1   :  { %12 = vsyncpa [#allocation3 + $0x1], 0  ;;  %s989_s18 = smov 0   ;;  %s991_s19 = smov 0  }
   0x2   :  { %s993_s20 = smov 0   ;;  %s995_s21 = smov 0  }
   0x3 LB: > { %s1010_s22 = sadd.s32 4294967295, %s952_s21   ;;  %s692_s23 = sadd.s32 4294967294, %s952_s21   ;;  %s952_s21 = sphi %s995_s21, %s1240_s21   ;;  %s948_s20 = sphi %s993_s20, %s1239_s20   ;;  %s944_s19 = sphi %s991_s19, %s1238_s19   ;;  %s940_s18 = sphi %s989_s18, %s1237_s18  }
   0x4   : > { %s1014_s24 = sadd.s32 1, %s952_s21   ;;  %s135_s25 = sadd.s32 1, %s948_s20 }
   0x5   : > { %s132_s26 = ssub.s32 %s952_s21, %s1014_s24  ;;  %p145_p0 = scmp.ne.s32.totalorder %s948_s20, %s944_s19 }
   0x6   : > { %p133_p1 = scmp.eq.s32.totalorder %s132_s26, 0  ;;  %p146_p2 = scmp.eq.s32.totalorder %s1010_s22, 1 }
   0x7   : > { %p151_p3 = scmp.ne.s32.totalorder %s944_s19, %s940_s18  ;;  %p152_p4 = scmp.eq.s32.totalorder %s692_s23, 1 }
   0x8   : > { %s1025_s27 = scalar_select %p133_p1, %s948_s20, %s135_s25  }
   0x9   : > { %p1027_p5 = por %p146_p2, %p145_p0  ;;  %p1031_p6 = por %p152_p4, %p151_p3 }
   0xa   : > { %p695_p7 = scmp.ge.s32.totalorder %s952_s21, 1  ;;  %p191_p8 = scmp.lt.s32.totalorder %s952_s21, 3 }
   0xc   : > { %p192_p9 = pnand %p695_p7, %p191_p8 }
   0xd   : > { %s697_s30 = sshll.u32 (!%p192_p9), %s1010_s22, 4  ;;  %s727_s26 = sshll.u32 (!%p192_p9), %s1010_s22, 7 }
   0xe   : > { %195 = sbr.rel (%p192_p9) target bundleno = 556 (0x22c), region = 40  ;;  %p220_p10 = scmp.lt.s32.totalorder (!%p192_p9), %s697_s30, 31 }
   0xf   : > { %s1194_s9 = scalar_lea.hbm (!%p192_p9), %s1234_s5, %s727_s26  ;;  %s958_s22 = smov (!%p192_p9), [#allocation2]  }
  0x10   : > { %s896_s12 = sshll.u32 (!%p192_p9), %s958_s22, 4  ;;  %s897_s12 = int_to_ptr.vmem [resolvable:$false] %s896_s12 }
  0x11   : > { %s898_s13 = scalar_lea.vmem (!%p192_p9), %s897_s12, 256 }
  0x13   : > { %v954_v0 = vmov 0.0   ;;  %vm955_vm0 = vmmov 0   ;;  %v956_v1 = vmov 0   ;;  %s1242_s30 = smov (!%p220_p10, %s697_s30), 31  ;;  %v257_v2 = vld [vmem:[%s1231_s2 + $0x38] sm:$0xff]  ;;  %v256_v3 = vld [vmem:[%s1231_s2 + $0x30] sm:$0xff] }
  0x14   : > { %765 = vmatprep.subr.mxu0 %v954_v0  ;;  %797 = vmatprep.mubr.msk.f32.mxu0 %vm955_vm0, %v954_v0  ;;  %s698_s10 = sshll.u32 %s1242_s30, 3  ;;  %vm304_vm1 = vcmask 261120   ;;  %v258_v4 = vld [vmem:[%s1231_s2 + $0x40] sm:$0x1]  ;;  %v255_v5 = vld [vmem:[%s1231_s2 + $0x28] sm:$0xff]  ;;  %v253_v9 = vld [vmem:[%s1231_s2 + $0x18] sm:$0xff] }
  0x15   : > { %888 = vset.pattern.permute.xlu0 %v956_v1  ;;  %889 = vset.pattern.permute.xlu1 %v956_v1  ;;  %s1056_s15 = scalar_lea.vmem %s1229_s0, %s698_s10  ;;  %v254_v8 = vld [vmem:[%s1231_s2 + $0x20] sm:$0xff]  ;;  %v252_v11 = vld [vmem:[%s1231_s2 + $0x10] sm:$0xff]  ;;  %v251_v12 = vld [vmem:[%s1231_s2 + $0x8] sm:$0xff]  ;;  %vm538_vm2 = vcmask 1040384   ;;  %vm534_vm3 = vcmask 531456  }
  0x16   : > { %824 = vmatprep.subr.mxu1 %v954_v0  ;;  %842 = vmatprep.mubr.msk.f32.mxu1 %vm955_vm0, %v954_v0  ;;  %v240_v6 = vld [vmem:[%s1056_s15 + $0x78] sm:$0xff]  ;;  %v239_v7 = vld [vmem:[%s1056_s15 + $0x70] sm:$0xff]  ;;  %v238_v10 = vld [vmem:[%s1056_s15 + $0x68] sm:$0xff] }
  0x17   : > { %296 = vperm.xlu0 %888, %v257_v2   ;;  %291 = vperm.xlu1 %889, %v256_v3   ;;  %v237_v13 = vld [vmem:[%s1056_s15 + $0x60] sm:$0xff]  ;;  %v236_v16 = vld [vmem:[%s1056_s15 + $0x58] sm:$0xff]  ;;  %v235_v17 = vld [vmem:[%s1056_s15 + $0x50] sm:$0xff] }
  0x18   : > { %766 = vmatpush3.xpose.msk.msra.mxu0 %vm304_vm1, %v240_v6  ;;  %v250_v14 = vld [vmem:[%s1231_s2] sm:$0xff]  ;;  %v234_v18 = vld [vmem:[%s1056_s15 + $0x48] sm:$0xff]  ;;  %v232_v20 = vld [vmem:[%s1056_s15 + $0x38] sm:$0xff] }
  0x19   : > { %767 = vmatprep.subr.mxu0 %v954_v0  ;;  %v528_v15 = vld [vmem:[%s1233_s4] sm:$0x3f]  ;;  %v231_v21 = vld [vmem:[%s1056_s15 + $0x30] sm:$0xff]  ;;  %v230_v22 = vld [vmem:[%s1056_s15 + $0x28] sm:$0xff] }
  0x1a   : > { %v233_v19 = vld [vmem:[%s1056_s15 + $0x40] sm:$0xff]  ;;  %v228_v24 = vld [vmem:[%s1056_s15 + $0x18] sm:$0xff]  ;;  %v227_v25 = vld [vmem:[%s1056_s15 + $0x10] sm:$0xff] }
  0x1b   : > { %301 = vperm.xlu0 %888, %v258_v4   ;;  %286 = vperm.xlu1 %889, %v255_v5   ;;  %v229_v23 = vld [vmem:[%s1056_s15 + $0x20] sm:$0xff]  ;;  %v226_v26 = vld [vmem:[%s1056_s15 + $0x8] sm:$0xff]  ;;  %v243_v30 = vld [vmem:[%s1230_s1 + $0x10] sm:$0xff] }
  0x1c   : > { %768 = vmatpush3.xpose.msk.msra.mxu0 %vm304_vm1, %v239_v7  ;;  %v225_v27 = vld [vmem:[%s1056_s15] sm:$0xff]  ;;  %v242_v29 = vld [vmem:[%s1230_s1 + $0x8] sm:$0xff]  ;;  %v244_v31 = vld [vmem:[%s1230_s1 + $0x18] sm:$0xff]  ;;  %s216_s15 = sand.u32 1, %s944_s19  }
  0x1d   : > { %769 = vmatprep.subr.mxu0 %v954_v0  ;;  %v241_v28 = vld [vmem:[%s1230_s1] sm:$0xff]  ;;  %v246_v33 = vld [vmem:[%s1230_s1 + $0x28] sm:$0xff]  ;;  %v247_v34 = vld [vmem:[%s1230_s1 + $0x30] sm:$0xff]  ;;  %s696_s25 = sshll.u32 %s216_s15, 3  ;;  %s620_s10 = scalar_lea.sflag [#allocation3], %s216_s15 }
  0x1e   : > { %v245_v32 = vld [vmem:[%s1230_s1 + $0x20] sm:$0xff]  ;;  %v248_v35 = vld [vmem:[%s1230_s1 + $0x38] sm:$0xff]  ;;  %s218_s30 = scalar_lea.vmem [#allocation2], %s696_s25 }
  0x1f   : > { %281 = vperm.xlu0 %888, %v254_v8   ;;  %276 = vperm.xlu1 %889, %v253_v9   ;;  %v249_v36 = vld [vmem:[%s1230_s1 + $0x40] sm:$0x1]  ;;  %s633_s6 = sshll.u32 %s218_s30, 4  ;;  %s634_s6 = int_to_ptr.vmem [resolvable:$true] %s633_s6 }
  0x20   : > { %770 = vmatpush3.xpose.msk.msra.mxu0 %vm304_vm1, %v238_v10  ;;  %s892_s11 = scalar_lea.vmem %s634_s6, 128  ;;  %p899_p0 = scmp.lt.s32.totalorder %s634_s6, %s897_s12 }
  0x21   : > { %771 = vmatprep.subr.mxu0 %v954_v0  ;;  %p893_p11 = scmp.ne.s32.totalorder %s634_s6, %s892_s11  ;;  %p900_p1 = scmp.lt.s32.totalorder %s898_s13, %s892_s11 }
  0x23   : > { %271 = vperm.xlu0 %888, %v252_v11   ;;  %266 = vperm.xlu1 %889, %v251_v12   ;;  %p894_p12 = pnand %p893_p11, %p1027_p5  ;;  %p901_p2 = por %p900_p1, %p899_p0 }
  0x24   : > { %772 = vmatpush3.xpose.msk.msra.mxu0 %vm304_vm1, %v237_v13 }
  0x25   : > { %773 = vmatprep.subr.mxu0 %v954_v0  ;;  %p895_p13 = pneg %p894_p12 }
  0x27   : > { %261 = vperm.xlu0 %888, %v250_v14   ;;  %531 = vperm.xlu1 %889, %v528_v15   ;;  %p902_p3 = pnand %p901_p2, %p895_p13 }
  0x28   : > { %774 = vmatpush3.xpose.msk.msra.mxu0 %vm304_vm1, %v236_v16 }
  0x29   : > { %775 = vmatprep.subr.mxu0 %v954_v0 }
  0x2c   : > { %776 = vmatpush3.xpose.msk.msra.mxu0 %vm304_vm1, %v235_v17 }
  0x2d   : > { %777 = vmatprep.subr.mxu0 %v954_v0 }
  0x30   : > { %778 = vmatpush3.xpose.msk.msra.mxu0 %vm304_vm1, %v234_v18  ;;  %v527_v18 = vld [vmem:[%s1232_s3] sm:$0x3f] }
  0x31   : > { %779 = vmatprep.subr.mxu0 %v954_v0 }
  0x34   : > { %780 = vmatpush3.xpose.msk.msra.mxu0 %vm304_vm1, %v233_v19 }
  0x35   : > { %781 = vmatprep.subr.mxu0 %v954_v0 }
  0x38   : > { %782 = vmatpush3.xpose.msk.msra.mxu0 %vm304_vm1, %v232_v20 }
  0x39   : > { %783 = vmatprep.subr.mxu0 %v954_v0 }
  0x3c   : > { %784 = vmatpush3.xpose.msk.msra.mxu0 %vm304_vm1, %v231_v21 }
  0x3d   : > { %785 = vmatprep.subr.mxu0 %v954_v0 }
  0x40   : > { %786 = vmatpush3.xpose.msk.msra.mxu0 %vm304_vm1, %v230_v22 }
  0x41   : > { %787 = vmatprep.subr.mxu0 %v954_v0 }
  0x44   : > { %788 = vmatpush3.xpose.msk.msra.mxu0 %vm304_vm1, %v229_v23  ;;  %v490_v23 = vlaneseq }
  0x45   : > { %789 = vmatprep.subr.mxu0 %v954_v0 }
  0x48   : > { %790 = vmatpush3.xpose.msk.msra.mxu0 %vm304_vm1, %v228_v24  ;;  %v491_v24 = vshrl.u32 %v490_v23, 7 }
  0x49   : > { %791 = vmatprep.subr.mxu0 %v954_v0 }
  0x4a   : > { %vm612_vm4 = vcmp.eq.s32.totalorder %v491_v24, 2  ;;  %vm614_vm5 = vcmp.lt.s32.totalorder %v491_v24, 3 }
  0x4c   : > { %792 = vmatpush3.xpose.msk.msra.mxu0 %vm304_vm1, %v227_v25  ;;  %v957_v25 = vmov 32.0  }
  0x4d   : > { %793 = vmatprep.subr.mxu0 %v954_v0 }
  0x50   : > { %794 = vmatpush3.xpose.msk.msra.mxu0 %vm304_vm1, %v226_v26  ;;  %v613_v26 = vsel %vm612_vm4, 3.1415927, %v957_v25 }
  0x51   : > { %795 = vmatprep.subr.mxu0 %v954_v0 }
  0x54   : > { %796 = vmatpush3.xpose.msk.msra.mxu0 %vm304_vm1, %v225_v27 }
  0x57   : > { %798 = vmatmul.mubr.msk.f32.vlgmr.msra.gmra.mxu0 %vm304_vm1, %v241_v28 }
  0x58   : > { %800 = vmatprep.mubr.msk.f32.mxu0 %vm955_vm0, %v954_v0 }
  0x5b   : > { %801 = vmatmul.mubr.msk.f32.gmra.mxu0 %vm304_vm1, %v242_v29 }
  0x5c   : > { %803 = vmatprep.mubr.msk.f32.mxu0 %vm955_vm0, %v954_v0 }
  0x5f   : > { %804 = vmatmul.mubr.msk.f32.gmra.mxu0 %vm304_vm1, %v243_v30 }
  0x60   : > { %806 = vmatprep.mubr.msk.f32.mxu0 %vm955_vm0, %v954_v0 }
  0x63   : > { %807 = vmatmul.mubr.msk.f32.gmra.mxu0 %vm304_vm1, %v244_v31 }
  0x64   : > { %809 = vmatprep.mubr.msk.f32.mxu0 %vm955_vm0, %v954_v0 }
  0x67   : > { %810 = vmatmul.mubr.msk.f32.gmra.mxu0 %vm304_vm1, %v245_v32 }
  0x68   : > { %812 = vmatprep.mubr.msk.f32.mxu0 %vm955_vm0, %v954_v0 }
  0x6b   : > { %813 = vmatmul.mubr.msk.f32.gmra.mxu0 %vm304_vm1, %v246_v33 }
  0x6c   : > { %815 = vmatprep.mubr.msk.f32.mxu0 %vm955_vm0, %v954_v0 }
  0x6f   : > { %816 = vmatmul.mubr.msk.f32.gmra.mxu0 %vm304_vm1, %v247_v34 }
  0x70   : > { %818 = vmatprep.mubr.msk.f32.mxu0 %vm955_vm0, %v954_v0 }
  0x73   : > { %819 = vmatmul.mubr.msk.f32.gmra.mxu0 %vm304_vm1, %v248_v35 }
  0x74   : > { %821 = vmatprep.mubr.msk.f32.mxu0 %vm955_vm0, %v954_v0 }
  0x77   : > { %822 = vmatmul.mubr.msk.f32.gmra.mxu0 %vm304_vm1, %v249_v36 }
  0x92   : > { %v297_v46 = vpop.permute.xlu0 %296  ;;  %v292_v49 = vpop.permute.xlu1 %291 }
  0x96   : > { %v302_v51 = vpop.permute.xlu0 %301  ;;  %v287_v54 = vpop.permute.xlu1 %286 }
  0x9a   : > { %v282_v56 = vpop.permute.xlu0 %281  ;;  %v277_v62 = vpop.permute.xlu1 %276 }
  0x9e   : > { %v272_v3 = vpop.permute.xlu0 %271  ;;  %v267_v8 = vpop.permute.xlu1 %266 }
  0xa2   : > { %v262_v11 = vpop.permute.xlu0 %261  ;;  %v532_v19 = vpop.permute.xlu1 %531 }
 0x117   : > { %v446_v37 = vpop.f32.mrf.mxu0 }
 0x118   : > { %v447_v14 = vadd.f32 %v446_v37, %v262_v11 }
 0x119   : > { %v799_v38 = vpop.f32.mrf.mxu0 }
 0x11a   : > { %v509_v17 = vmax.f32 %v447_v14, 0.0 }
 0x11b   : > { %v451_v39 = vpop.f32.mrf.mxu0 }
 0x11c   : > { %v452_v12 = vadd.f32 %v451_v39, %v267_v8 }
 0x11d   : > { %v802_v40 = vpop.f32.mrf.mxu0 }
 0x11e   : > { %v510_v16 = vmax.f32 %v452_v12, 0.0 }
 0x11f   : > { %v456_v41 = vpop.f32.mrf.mxu0 }
 0x120   : > { %v457_v9 = vadd.f32 %v456_v41, %v272_v3 }
 0x121   : > { %v805_v42 = vpop.f32.mrf.mxu0 }
 0x122   : > { %v511_v15 = vmax.f32 %v457_v9, 0.0 }
 0x123   : > { %v461_v43 = vpop.f32.mrf.mxu0 }
 0x124   : > { %v462_v6 = vadd.f32 %v461_v43, %v277_v62 }
 0x125   : > { %v808_v44 = vpop.f32.mrf.mxu0 }
 0x126   : > { %v512_v13 = vmax.f32 %v462_v6, 0.0 }
 0x127   : > { %v466_v45 = vpop.f32.mrf.mxu0 }
 0x128   : > { %v467_v4 = vadd.f32 %v466_v45, %v282_v56 }
 0x129   : > { %v811_v47 = vpop.f32.mrf.mxu0 }
 0x12a   : > { %v513_v10 = vmax.f32 %v467_v4, 0.0 }
 0x12b   : > { %v471_v48 = vpop.f32.mrf.mxu0 }
 0x12c   : > { %v472_v1 = vadd.f32 %v471_v48, %v287_v54 }
 0x12d   : > { %v814_v50 = vpop.f32.mrf.mxu0 }
 0x12e   : > { %v514_v7 = vmax.f32 %v472_v1, 0.0 }
 0x12f   : > { %v476_v52 = vpop.f32.mrf.mxu0 }
 0x130   : > { %v477_v60 = vadd.f32 %v476_v52, %v292_v49 }
 0x131   : > { %v817_v53 = vpop.f32.mrf.mxu0 }
 0x132   : > { %v515_v5 = vmax.f32 %v477_v60, 0.0 }
 0x133   : > { %v481_v55 = vpop.f32.mrf.mxu0 }
 0x134   : > { %v482_v58 = vadd.f32 %v481_v55, %v297_v46 }
 0x135   : > { %v820_v57 = vpop.f32.mrf.mxu0 }
 0x136   : > { %v516_v2 = vmax.f32 %v482_v58, 0.0 }
 0x137   : > { %v486_v59 = vpop.f32.mrf.mxu0 }
 0x138   : > { %v487_v61 = vadd.f32 %v486_v59, %v302_v51 }
 0x139   : > { %v823_v63 = vpop.f32.mrf.mxu0 }
 0x13a   : > { %825 = vmatpush3.msk.msra.mxu1 %vm538_vm2, %v487_v61 }
 0x13b   : > { %826 = vmatprep.subr.mxu1 %v954_v0 }
 0x13c   : > { %827 = vmatpush3.msra.mxu1 %v516_v2 }
 0x13d   : > { %828 = vmatprep.subr.mxu1 %v954_v0 }
 0x13e   : > { %829 = vmatpush3.msra.mxu1 %v515_v5 }
 0x13f   : > { %830 = vmatprep.subr.mxu1 %v954_v0 }
 0x140   : > { %831 = vmatpush3.msra.mxu1 %v514_v7 }
 0x141   : > { %832 = vmatprep.subr.mxu1 %v954_v0 }
 0x142   : > { %833 = vmatpush3.msra.mxu1 %v513_v10 }
 0x143   : > { %834 = vmatprep.subr.mxu1 %v954_v0 }
 0x144   : > { %835 = vmatpush3.msra.mxu1 %v512_v13 }
 0x145   : > { %836 = vmatprep.subr.mxu1 %v954_v0 }
 0x146   : > { %837 = vmatpush3.msra.mxu1 %v511_v15 }
 0x147   : > { %838 = vmatprep.subr.mxu1 %v954_v0 }
 0x148   : > { %839 = vmatpush3.msra.mxu1 %v510_v16 }
 0x149   : > { %840 = vmatprep.subr.mxu1 %v954_v0 }
 0x14a   : > { %841 = vmatpush3.msra.mxu1 %v509_v17 }
 0x14b   : > { %843 = vmatmul.mubr.msk.f32.vlgmr.msra.gmra.mxu1 %vm534_vm3, %v527_v18 }
 0x20b   : > { %v608_v20 = vpop.f32.mrf.mxu1 }
 0x20c   : > { %v609_v21 = vadd.f32 %v608_v20, %v532_v19 }
 0x20d   : > { %v844_v22 = vpop.f32.mrf.mxu1 }
 0x20e   : > { %890 = vtanh.f32 %v609_v21 }
 0x21b   : > { %v891_v27 = vpop.eup %890 }
 0x21c   : > { %v616_v0 = vmul.f32 %v891_v27, %v613_v26 }
 0x21e   : > { %v617_v28 = vsel %vm614_vm5, %v616_v0, %v609_v21 }
 0x21f   : > { %618 = vst [vmem:[%s218_s30] sm:$0x3f] %v617_v28 }
 0x220   : > { %905 = shalt.err (!%p902_p3)
}
 0x221   : > { %s906_s14 = scalar_lea.hbm %s1194_s9, 128  ;;  %s910_s23 = scalar_lea.hbm %s1234_s5, 256 }
 0x222   : > { %p907_p4 = scmp.ne.s32.totalorder %s1194_s9, %s906_s14  ;;  %p911_p9 = scmp.lt.s32.totalorder %s1194_s9, %s1234_s5 }
 0x223   : > { %p912_p10 = scmp.lt.s32.totalorder %s910_s23, %s906_s14 }
 0x224   : > { %p908_p7 = pnand %p907_p4, %p1027_p5 }
 0x225   : > { %p913_p11 = por %p912_p10, %p911_p9 }
 0x226   : > { %p909_p8 = pneg %p908_p7 }
 0x228   : > { %p914_p12 = pnand %p913_p11, %p909_p8 }
 0x22a   : > { %917 = shalt.err (!%p914_p12)
}
 0x22b   : > { %845 = dma.vmem_to_hbm [thread:$0]  (%p1027_p5), %s634_s6, 128, %s1194_s9, %s620_s10  }
 0x22c PF: > { %p851_p13 = scmp.ge.s32.totalorder %s952_s21, 2  ;;  %s645_s26 = sand.u32 1, %s940_s18  }
 0x22d   : > { %s646_s30 = scalar_lea.sflag [#allocation3], %s645_s26 }
 0x22e   : > { %p848_p0 = pnand %p851_p13, %p1031_p6 }
 0x230   : > { %p849_p1 = pneg %p848_p0 }
 0x232   : > { %935 = dma.done.wait (%p849_p1), %s646_s30, 128  }
 0x233   : > { %937 = vsyncadd (%p849_p1), %s646_s30, 4294967168  ;;  %p15_p2 = scmp.ge.s32.totalorder %s1014_s24, 4   ;;  %s1237_s18 = smov %s944_s19 }
 0x234   : > { %s1238_s19 = smov %s948_s20  ;;  %s1239_s20 = smov %s1025_s27 }
 0x235   : > { %s1240_s21 = smov %s1014_s24  ;;  %17 = sbr.rel (!%p15_p2) target bundleno = 3 (0x3), region = 75 }
 0x23a   :  { %651 = vsyncpa [#allocation3], 1 }
 0x23b   :  { %653 = vsyncpa [#allocation3 + $0x1], 1 }

</bundles_post_ra>
